<compile_context>
chip_gen: v7x
topology: tpu7x:2x2x1
jax: 0.10.0
libtpu: 0.0.40
codegen_flags: <defaults>
</compile_context>

<pallas_src>
import math
import jax
import jax.numpy as jnp
from jax import lax
from jax.experimental import pallas as pl
from jax.experimental.pallas import tpu as pltpu


# ----------------------------- kernel ---------------------------------------

def _l2_normalize_rows(h):
    # F.normalize(dim=1): h / max(||h||, 1e-12)  ==  h * rsqrt(max(sumsq, 1e-24))
    sumsq = jnp.sum(h * h, axis=-1, keepdims=True)
    return h * lax.rsqrt(jnp.maximum(sumsq, 1e-24))


def _make_fused_fa_gcn_kernel(num_blocks):
    """Build the fused FA_GCN forward kernel for a static number of GCN blocks."""

    def kernel(*refs):
        a_ref, x_ref = refs[0], refs[1]
        w_refs = refs[2:2 + num_blocks]
        wf_ref = refs[2 + num_blocks]
        o_ref = refs[3 + num_blocks]

        a_bf = a_ref[...]          # bf16 already (cast once in the wrapper)
        emb = x_ref[...]           # bf16
        outputs = [emb]

        for w_ref in w_refs:
            # emb @ W   (MXU, bf16 operands, f32 accumulation)
            xw = jnp.dot(emb, w_ref[...], preferred_element_type=jnp.float32)
            # A_hat @ (emb @ W)   (MXU)
            h = jnp.dot(a_bf, xw.astype(jnp.bfloat16),
                        preferred_element_type=jnp.float32)
            h = jnp.tanh(h)               # EUP
            h = _l2_normalize_rows(h)     # f32 epilogue, rsqrt on EUP
            h_bf = h.astype(jnp.bfloat16)  # single cast, reused twice below
            outputs.append(h_bf)
            emb = h_bf

        # torch.cat(outputs, dim=1) @ W_f as ONE MXU pass with K = D_cat.
        # The concat lives in registers; no HBM round-trip, no W_f slicing.
        cat = jnp.concatenate(outputs, axis=-1)            # (N, D_cat) bf16
        out = jnp.dot(cat, wf_ref[...], preferred_element_type=jnp.float32)

        o_ref[...] = _l2_normalize_rows(out).astype(o_ref.dtype)

    return kernel


# ----------------------------- wrapper ---------------------------------------

def _vmem_limit_bytes():
    """Generation-aware scoped-VMEM limit with headroom for compiler scratch."""
    try:
        cap = int(pltpu.get_tpu_info().vmem_capacity_bytes)
    except Exception:
        return 48 * 1024 * 1024          # safe on v5e / v6e / v7x
    limit = min(int(cap * 0.8), cap - 8 * 1024 * 1024)
    return max(16 * 1024 * 1024, limit)


def fa_gcn_forward_fused(a_hat, x, gcn_weights, w_fully):
    n, d_in = x.shape
    d_cat, d_out = w_fully.shape
    num_blocks = len(gcn_weights)

    # bf16 in HBM: halves DMA + VMEM for the O(N^2) adjacency; f32 MXU accum.
    a_bf = a_hat.astype(jnp.bfloat16)
    x_bf = x.astype(jnp.bfloat16)
    ws_bf = [w.astype(jnp.bfloat16) for w in gcn_weights]
    wf_bf = w_fully.astype(jnp.bfloat16)

    # Full arrays resident in VMEM, single-buffered (no pipelining needed for
    # a single-program kernel).
    vmem_spec = pl.BlockSpec(memory_space=pltpu.MemorySpace.VMEM)

    # Advisory cost estimate for XLA's scheduler.
    flops = 2 * n * d_cat * d_out
    d = d_in
    for _ in range(num_blocks):
        flops += 2 * n * d * d_out + 2 * n * n * d_out
        d = d_out
    transcendentals = num_blocks * n * d_out + (num_blocks + 1) * n
    bytes_accessed = int(
        2 * (a_bf.size + x_bf.size + wf_bf.size + sum(w.size for w in ws_bf))
        + 4 * n * d_out)

    return pl.pallas_call(
        _make_fused_fa_gcn_kernel(num_blocks),
        out_shape=jax.ShapeDtypeStruct((n, d_out), jnp.float32),
        in_specs=[vmem_spec] * (2 + num_blocks + 1),
        out_specs=vmem_spec,
        compiler_params=pltpu.CompilerParams(
            vmem_limit_bytes=_vmem_limit_bytes()),
        cost_estimate=pl.CostEstimate(
            flops=int(flops),
            transcendentals=int(transcendentals),
            bytes_accessed=bytes_accessed),
    )(a_bf, x_bf, *ws_bf, wf_bf)


# ----------------------------- model ---------------------------------------

def xavier_uniform(key, shape, gain):
    fan_in, fan_out = shape  # W stored pre-transposed: (in, out)
    limit = gain * math.sqrt(6.0 / (fan_in + fan_out))
    return jax.random.uniform(key, shape, jnp.float32, minval=-limit, maxval=limit)


def init_fa_gcn_params(key, num_gcn_blocks, input_dim, output_dim):
    gain = 5.0 / 3.0  # nn.init.calculate_gain('tanh')
    keys = jax.random.split(key, num_gcn_blocks + 1)
    params = {"gcn_weights": [], "fully": None}
    d_in = input_dim
    for i in range(num_gcn_blocks):
        params["gcn_weights"].append(xavier_uniform(keys[i], (d_in, output_dim), gain))
        d_in = output_dim
    d_cat = input_dim + output_dim * num_gcn_blocks
    params["fully"] = xavier_uniform(keys[-1], (d_cat, output_dim), gain)
    return params


@jax.jit
def fa_gcn_forward(params, a_hat, x):
    """Mirrors FA_GCN.forward(A_hat, input) with activation='tanh'."""
    return fa_gcn_forward_fused(a_hat, x, params["gcn_weights"], params["fully"])


def fa_gcn_forward_ref(params, a_hat, x):
    """Pure-JAX f32 reference (mirrors the torch module exactly)."""
    def normalize(h):
        nrm = jnp.sqrt(jnp.sum(h * h, axis=1, keepdims=True))
        return h / jnp.maximum(nrm, 1e-12)

    emb = x
    outs = [x]
    for w in params["gcn_weights"]:
        h = normalize(jnp.tanh(a_hat @ (emb @ w)))
        outs.append(h)
        emb = h
    cat = jnp.concatenate(outs, axis=1)
    return normalize(cat @ params["fully"])


# ----------------------------- main ---------------------------------------

if __name__ == "__main__":
    N = 64            # number of graph nodes
    INPUT_DIM = 32
    OUTPUT_DIM = 32
    NUM_BLOCKS = 2

    key = jax.random.PRNGKey(0)
    k_a, k_x, k_p = jax.random.split(key, 3)

    # Deterministic symmetric normalized adjacency A_hat.
    adj_raw = (jax.random.uniform(k_a, (N, N)) > 0.7).astype(jnp.float32)
    adj = jnp.maximum(adj_raw, adj_raw.T) + jnp.eye(N, dtype=jnp.float32)
    deg = jnp.sum(adj, axis=1)
    d_inv_sqrt = 1.0 / jnp.sqrt(deg)
    a_hat = adj * d_inv_sqrt[:, None] * d_inv_sqrt[None, :]

    x = jax.random.normal(k_x, (N, INPUT_DIM), jnp.float32)
    params = init_fa_gcn_params(k_p, NUM_BLOCKS, INPUT_DIM, OUTPUT_DIM)

    out = fa_gcn_forward(params, a_hat, x)
    jax.block_until_ready(out)
    assert out.shape == (N, OUTPUT_DIM)
    assert bool(jnp.all(jnp.isfinite(out)))

    # Loose tolerance: kernel matmuls use bf16 operands (f32 accumulation).
    ref = fa_gcn_forward_ref(params, a_hat, x)
    max_err = float(jnp.max(jnp.abs(out - ref)))
    assert max_err < 1e-1, f"max abs err vs f32 reference: {max_err}"

    print("KERNEL_OK")
</pallas_src>

<mosaic_0001>
module attributes {stable_mosaic.version = 11 : i64} {
  func.func @kernel(%arg0: memref<64x64xbf16, #tpu.memory_space<vmem>>, %arg1: memref<64x32xbf16, #tpu.memory_space<vmem>>, %arg2: memref<32x32xbf16, #tpu.memory_space<vmem>>, %arg3: memref<32x32xbf16, #tpu.memory_space<vmem>>, %arg4: memref<96x32xbf16, #tpu.memory_space<vmem>>, %arg5: memref<64x32xf32, #tpu.memory_space<vmem>>) attributes {dimension_semantics = [], scalar_prefetch = 0 : i64, scratch_operands = 0 : i64, tpu.core_type = #tpu.core_type<tc>} {
    %c0 = arith.constant 0 : index
    %c0_0 = arith.constant 0 : index
    %0 = vector.load %arg0[%c0, %c0_0] : memref<64x64xbf16, #tpu.memory_space<vmem>>, vector<64x64xbf16>
    %c0_1 = arith.constant 0 : index
    %c0_2 = arith.constant 0 : index
    %1 = vector.load %arg1[%c0_1, %c0_2] : memref<64x32xbf16, #tpu.memory_space<vmem>>, vector<64x32xbf16>
    %c0_3 = arith.constant 0 : index
    %c0_4 = arith.constant 0 : index
    %2 = vector.load %arg2[%c0_3, %c0_4] : memref<32x32xbf16, #tpu.memory_space<vmem>>, vector<32x32xbf16>
    %cst = arith.constant dense<0.000000e+00> : vector<64x32xf32>
    %3 = tpu.matmul %1, %2, %cst {dimension_numbers = #tpu.dot_dimension_numbers<[1], [0], [0], [1], [0, 0, 1, 1], [], []>} : vector<64x32xbf16>, vector<32x32xbf16>, vector<64x32xf32> -> vector<64x32xf32>
    %4 = arith.truncf %3 : vector<64x32xf32> to vector<64x32xbf16>
    %cst_5 = arith.constant dense<0.000000e+00> : vector<64x32xf32>
    %5 = tpu.matmul %0, %4, %cst_5 {dimension_numbers = #tpu.dot_dimension_numbers<[1], [0], [0], [1], [0, 0, 1, 1], [], []>} : vector<64x64xbf16>, vector<64x32xbf16>, vector<64x32xf32> -> vector<64x32xf32>
    %6 = math.tanh %5 : vector<64x32xf32>
    %7 = arith.mulf %6, %6 : vector<64x32xf32>
    %cst_6 = arith.constant dense<0.000000e+00> : vector<64xf32>
    %8 = vector.multi_reduction <add>, %7, %cst_6 [1] : vector<64x32xf32> to vector<64xf32>
    %9 = vector.shape_cast %8 : vector<64xf32> to vector<64x1xf32>
    %cst_7 = arith.constant 1.000000e-24 : f32
    %10 = vector.broadcast %cst_7 : f32 to vector<64x1xf32>
    %11 = arith.maximumf %9, %10 : vector<64x1xf32>
    %12 = math.rsqrt %11 : vector<64x1xf32>
    %13 = vector.broadcast %12 : vector<64x1xf32> to vector<64x32xf32>
    %14 = arith.mulf %6, %13 : vector<64x32xf32>
    %15 = arith.truncf %14 : vector<64x32xf32> to vector<64x32xbf16>
    %c0_8 = arith.constant 0 : index
    %c0_9 = arith.constant 0 : index
    %16 = vector.load %arg3[%c0_8, %c0_9] : memref<32x32xbf16, #tpu.memory_space<vmem>>, vector<32x32xbf16>
    %cst_10 = arith.constant dense<0.000000e+00> : vector<64x32xf32>
    %17 = tpu.matmul %15, %16, %cst_10 {dimension_numbers = #tpu.dot_dimension_numbers<[1], [0], [0], [1], [0, 0, 1, 1], [], []>} : vector<64x32xbf16>, vector<32x32xbf16>, vector<64x32xf32> -> vector<64x32xf32>
    %18 = arith.truncf %17 : vector<64x32xf32> to vector<64x32xbf16>
    %cst_11 = arith.constant dense<0.000000e+00> : vector<64x32xf32>
    %19 = tpu.matmul %0, %18, %cst_11 {dimension_numbers = #tpu.dot_dimension_numbers<[1], [0], [0], [1], [0, 0, 1, 1], [], []>} : vector<64x64xbf16>, vector<64x32xbf16>, vector<64x32xf32> -> vector<64x32xf32>
    %20 = math.tanh %19 : vector<64x32xf32>
    %21 = arith.mulf %20, %20 : vector<64x32xf32>
    %cst_12 = arith.constant dense<0.000000e+00> : vector<64xf32>
    %22 = vector.multi_reduction <add>, %21, %cst_12 [1] : vector<64x32xf32> to vector<64xf32>
    %23 = vector.shape_cast %22 : vector<64xf32> to vector<64x1xf32>
    %cst_13 = arith.constant 1.000000e-24 : f32
    %24 = vector.broadcast %cst_13 : f32 to vector<64x1xf32>
    %25 = arith.maximumf %23, %24 : vector<64x1xf32>
    %26 = math.rsqrt %25 : vector<64x1xf32>
    %27 = vector.broadcast %26 : vector<64x1xf32> to vector<64x32xf32>
    %28 = arith.mulf %20, %27 : vector<64x32xf32>
    %29 = arith.truncf %28 : vector<64x32xf32> to vector<64x32xbf16>
    %30 = tpu.concatenate %1, %15, %29 in 1 : vector<64x32xbf16>, vector<64x32xbf16>, vector<64x32xbf16> -> vector<64x96xbf16>
    %c0_14 = arith.constant 0 : index
    %c0_15 = arith.constant 0 : index
    %31 = vector.load %arg4[%c0_14, %c0_15] : memref<96x32xbf16, #tpu.memory_space<vmem>>, vector<96x32xbf16>
    %cst_16 = arith.constant dense<0.000000e+00> : vector<64x32xf32>
    %32 = tpu.matmul %30, %31, %cst_16 {dimension_numbers = #tpu.dot_dimension_numbers<[1], [0], [0], [1], [0, 0, 1, 1], [], []>} : vector<64x96xbf16>, vector<96x32xbf16>, vector<64x32xf32> -> vector<64x32xf32>
    %33 = arith.mulf %32, %32 : vector<64x32xf32>
    %cst_17 = arith.constant dense<0.000000e+00> : vector<64xf32>
    %34 = vector.multi_reduction <add>, %33, %cst_17 [1] : vector<64x32xf32> to vector<64xf32>
    %35 = vector.shape_cast %34 : vector<64xf32> to vector<64x1xf32>
    %cst_18 = arith.constant 1.000000e-24 : f32
    %36 = vector.broadcast %cst_18 : f32 to vector<64x1xf32>
    %37 = arith.maximumf %35, %36 : vector<64x1xf32>
    %38 = math.rsqrt %37 : vector<64x1xf32>
    %39 = vector.broadcast %38 : vector<64x1xf32> to vector<64x32xf32>
    %40 = arith.mulf %32, %39 : vector<64x32xf32>
    %c0_19 = arith.constant 0 : index
    %c0_20 = arith.constant 0 : index
    %41 = vector.load %arg5[%c0_19, %c0_20] : memref<64x32xf32, #tpu.memory_space<vmem>>, vector<64x32xf32>
    tpu.vector_store %arg5[%c0_19, %c0_20], %40 {strides = array<i32>} : memref<64x32xf32, #tpu.memory_space<vmem>>, vector<64x32xf32>,
    return
  }
}

</mosaic_0001>

<bundles_post_ra>
// kernel: fa_gcn_forward.1
= control target key start
LH: loop header
LB: loop body
LE: loop exit
PB: predicated region body
PF: predicated region fallthrough
CT: control target
= control target key end

     0   :  { %vm73_vm0 = vcmask 261120   ;;  %vm175_vm1 = vcmask 523264   ;;  %vm639_vm2 = vcmask 785408   ;;  %s1331_s2 = inlined_call_operand.vmem [shape: bf16[32,32], index: 2, kind: input, shape index: {}]   ;;  %s1332_s1 = inlined_call_operand.vmem [shape: bf16[64,32], index: 1, kind: input, shape index: {}]   ;;  %s1333_s0 = inlined_call_operand.vmem [shape: bf16[64,64], index: 0, kind: input, shape index: {}]   ;;  %s1334_s3 = inlined_call_operand.vmem [shape: bf16[32,32], index: 3, kind: input, shape index: {}]   ;;  %s1335_s4 = inlined_call_operand.vmem [shape: bf16[96,32], index: 4, kind: input, shape index: {}]   ;;  %s1336_s5 = inlined_call_operand.vmem [shape: f32[64,32], index: 5, kind: output, shape index: {}]  }
   0x1   :  { %v935_v0 = vld [vmem:[%s1331_s2] sm:$0xff]   ;;  %v936_v1 = vld [vmem:[%s1331_s2 + $0x8] sm:$0xff]   ;;  %v1086_v4 = vld [vmem:[%s1332_s1 + $0x10] sm:$0xff]  }
   0x2   :  { %857 = vmatprep.subr.bf16.mxu1 %v935_v0  ;;  %v1074_v2 = vld [vmem:[%s1332_s1] sm:$0xff]   ;;  %v1081_v3 = vld [vmem:[%s1332_s1 + $0x8] sm:$0xff]   ;;  %v1095_v5 = vld [vmem:[%s1332_s1 + $0x18] sm:$0xff]  }
   0x3   :  { %858 = vmatpush3.bf16.msra.mxu1 %v935_v0  ;;  %861 = vmatprep.mubr.msk.bf16.mxu1 %vm73_vm0, %v1074_v2  ;;  %v941_v6 = vld [vmem:[%s1333_s0] sm:$0xff]   ;;  %v1106_v19 = vld [vmem:[%s1333_s0 + $0x8] sm:$0xff]   ;;  %v1111_v20 = vld [vmem:[%s1333_s0 + $0x10] sm:$0xff]  }
   0x4   :  { %859 = vmatprep.subr.bf16.mxu1 %v936_v1  ;;  %v1120_v21 = vld [vmem:[%s1333_s0 + $0x18] sm:$0xff]   ;;  %v945_v54 = vld [vmem:[%s1334_s3] sm:$0xff]   ;;  %v946_v55 = vld [vmem:[%s1334_s3 + $0x8] sm:$0xff]   ;;  %s1033_s3 = smov 32  }
   0x5   :  { %885 = vmatprep.subr.bf16.mxu0 %v945_v54 }
   0x6   :  { %886 = vmatpush3.bf16.msra.mxu0 %v945_v54 }
   0x7   :  { %860 = vmatpush3.bf16.msra.mxu1 %v936_v1  ;;  %887 = vmatprep.subr.bf16.mxu0 %v946_v55 }
   0xa   :  { %862 = vmatmul.mubr.msk.bf16.vlgmr.msra.gmra.mrb[0].mxu1 %vm73_vm0, %v1081_v3  ;;  %888 = vmatpush3.bf16.msra.mxu0 %v946_v55 }
   0xb   :  { %865 = vmatprep.mubr.msk.bf16.mxu1 %vm73_vm0, %v1086_v4 }
  0x12   :  { %866 = vmatmul.mubr.msk.bf16.gmra.mrb[4].mxu1 %vm73_vm0, %v1095_v5 }
  0x13   :  { %877 = vmatprep.mubr.msk.bf16.mxu1 %vm175_vm1, %v941_v6 }
  0xdd   :  { %v863_v7 = vpop.f32.mrb[0].mxu1 }
  0xde   :  { %v120_v8 = vpop.f32.mrb[1].mxu1 }
  0xdf   :  { %v864_v9 = vpop.f32.mrb[2].mxu1 }
  0xe0   :  { %v152_v10 = vpack.c.bf16 %v864_v9, %v863_v7  ;;  %v123_v11 = vpop.f32.mrb[3].mxu1 }
  0xe1   :  { %v151_v12 = vpack.c.bf16 %v123_v11, %v120_v8 }
  0xe3   :  { %869 = vmatprep.subr.bf16.mxu1 %v151_v12 }
  0xe4   :  { %870 = vmatpush3.bf16.msra.mxu1 %v151_v12 }
  0xe5   :  { %v867_v13 = vpop.f32.mrb[4].mxu1  ;;  %871 = vmatprep.subr.bf16.mxu1 %v152_v10 }
  0xe6   :  { %v136_v14 = vpop.f32.mrb[5].mxu1 }
  0xe7   :  { %v868_v15 = vpop.f32.mrb[6].mxu1 }
  0xe8   :  { %v154_v16 = vpack.c.bf16 %v868_v15, %v867_v13  ;;  %v139_v17 = vpop.f32.mrb[7].mxu1  ;;  %872 = vmatpush3.bf16.msra.mxu1 %v152_v10 }
  0xe9   :  { %v153_v18 = vpack.c.bf16 %v139_v17, %v136_v14 }
  0xeb   :  { %873 = vmatprep.subr.bf16.mxu1 %v153_v18 }
  0xec   :  { %874 = vmatpush3.bf16.msra.mxu1 %v153_v18 }
  0xed   :  { %875 = vmatprep.subr.bf16.mxu1 %v154_v16 }
  0xf0   :  { %876 = vmatpush3.bf16.msra.mxu1 %v154_v16 }
  0xf3   :  { %878 = vmatmul.mubr.msk.bf16.vlgmr.msra.gmra.mrb[8].mxu1 %vm175_vm1, %v1106_v19 }
  0xf4   :  { %881 = vmatprep.mubr.msk.bf16.mxu1 %vm175_vm1, %v1111_v20 }
  0xfb   :  { %882 = vmatmul.mubr.msk.bf16.gmra.mrb[12].mxu1 %vm175_vm1, %v1120_v21 }
  0xfc   :  { %905 = vmatprep.mubr.msk.bf16.mxu1 %vm175_vm1, %v941_v6 }
 0x1c6   :  { %v879_v22 = vpop.f32.mrb[8].mxu1 }
 0x1c7   :  { %953 = vtanh.f32 %v879_v22  ;;  %v222_v23 = vpop.f32.mrb[9].mxu1 }
 0x1c8   :  { %955 = vtanh.f32 %v222_v23  ;;  %v880_v24 = vpop.f32.mrb[10].mxu1 }
 0x1c9   :  { %957 = vtanh.f32 %v880_v24  ;;  %v225_v25 = vpop.f32.mrb[11].mxu1 }
 0x1ca   :  { %959 = vtanh.f32 %v225_v25 }
 0x1ce   :  { %v883_v26 = vpop.f32.mrb[12].mxu1 }
 0x1cf   :  { %961 = vtanh.f32 %v883_v26  ;;  %v238_v27 = vpop.f32.mrb[13].mxu1 }
 0x1d0   :  { %963 = vtanh.f32 %v238_v27  ;;  %v884_v28 = vpop.f32.mrb[14].mxu1 }
 0x1d1   :  { %v1125_v29 = vpop.eup %953  ;;  %965 = vtanh.f32 %v884_v28  ;;  %v241_v30 = vpop.f32.mrb[15].mxu1 }
 0x1d2   :  { %v1127_v31 = vpop.eup %955  ;;  %967 = vtanh.f32 %v241_v30  ;;  %v263_v32 = vmul.f32 %v1125_v29, %v1125_v29 }
 0x1d3   :  { %v1131_v33 = vpop.eup %957  ;;  %v261_v34 = vmul.f32 %v1127_v31, %v1127_v31 }
 0x1d4   :  { %v1135_v35 = vpop.eup %959  ;;  %v275_v36 = vsel %vm73_vm0, %v263_v32, 0.0  ;;  %v264_v37 = vmul.f32 %v1131_v33, %v1131_v33 }
 0x1d5   :  { %276 = vadd.xlane.f32.xlu1 %v275_v36  ;;  %v269_v38 = vsel %vm73_vm0, %v261_v34, 0.0  ;;  %v262_v39 = vmul.f32 %v1135_v35, %v1135_v35 }
 0x1d6   :  { %270 = vadd.xlane.f32.xlu0 %v269_v38  ;;  %v278_v40 = vsel %vm73_vm0, %v264_v37, 0.0 }
 0x1d7   :  { %v272_v42 = vsel %vm73_vm0, %v262_v39, 0.0 }
 0x1d9   :  { %v1144_v41 = vpop.eup %961  ;;  %279 = vadd.xlane.f32.xlu1 %v278_v40 }
 0x1da   :  { %v964_v43 = vpop.eup %963  ;;  %273 = vadd.xlane.f32.xlu0 %v272_v42  ;;  %v267_v49 = vmul.f32 %v1144_v41, %v1144_v41 }
 0x1db   :  { %v1147_v44 = vpop.eup %965  ;;  %v265_v45 = vmul.f32 %v964_v43, %v964_v43 }
 0x1dc   :  { %v968_v46 = vpop.eup %967  ;;  %v268_v51 = vmul.f32 %v1147_v44, %v1147_v44  ;;  %v287_v52 = vsel %vm73_vm0, %v267_v49, 0.0 }
 0x1dd   :  { %v281_v47 = vsel %vm73_vm0, %v265_v45, 0.0  ;;  %v266_v48 = vmul.f32 %v968_v46, %v968_v46 }
 0x1de   :  { %282 = vadd.xlane.f32.xlu0 %v281_v47  ;;  %v290_v53 = vsel %vm73_vm0, %v268_v51, 0.0 }
 0x1df   :  { %v284_v50 = vsel %vm73_vm0, %v266_v48, 0.0 }
 0x1e0   :  { %285 = vadd.xlane.f32.xlu1 %v284_v50 }
 0x1e2   :  { %288 = vadd.xlane.f32.xlu0 %v287_v52 }
 0x1e4   :  { %291 = vadd.xlane.f32.xlu1 %v290_v53 }
 0x262   :  { %v277_v56 = vpop.xlane.xlu1 %276 }
 0x263   :  { %v295_v57 = vmax.f32 %v277_v56, 1e-24  ;;  %v271_v58 = vpop.xlane.xlu0 %270 }
 0x264   :  { %v293_v59 = vmax.f32 %v271_v58, 1e-24 }
 0x265   :  { %969 = vrsqrt.f32 %v295_v57 }
 0x266   :  { %v280_v60 = vpop.xlane.xlu1 %279  ;;  %971 = vrsqrt.f32 %v293_v59 }
 0x267   :  { %v296_v61 = vmax.f32 %v280_v60, 1e-24  ;;  %v274_v62 = vpop.xlane.xlu0 %273 }
 0x268   :  { %v294_v63 = vmax.f32 %v274_v62, 1e-24 }
 0x269   :  { %973 = vrsqrt.f32 %v296_v61 }
 0x26a   :  { %975 = vrsqrt.f32 %v294_v63 }
 0x26b   :  { %v283_v0 = vpop.xlane.xlu0 %282 }
 0x26c   :  { %v297_v1 = vmax.f32 %v283_v0, 1e-24 }
 0x26d   :  { %v286_v6 = vpop.xlane.xlu1 %285 }
 0x26e   :  { %977 = vrsqrt.f32 %v297_v1  ;;  %v298_v7 = vmax.f32 %v286_v6, 1e-24 }
 0x26f   :  { %v289_v8 = vpop.xlane.xlu0 %288  ;;  %v970_v10 = vpop.eup %969 }
 0x270   :  { %979 = vrsqrt.f32 %v298_v7  ;;  %v299_v9 = vmax.f32 %v289_v8, 1e-24  ;;  %v972_v12 = vpop.eup %971  ;;  %v311_v22 = vmul.f32 %v970_v10, %v1125_v29 }
 0x271   :  { %v292_v11 = vpop.xlane.xlu1 %291  ;;  %v309_v17 = vmul.f32 %v972_v12, %v1127_v31 }
 0x272   :  { %981 = vrsqrt.f32 %v299_v9  ;;  %v300_v13 = vmax.f32 %v292_v11, 1e-24 }
 0x273   :  { %v974_v14 = vpop.eup %973 }
 0x274   :  { %v976_v15 = vpop.eup %975  ;;  %983 = vrsqrt.f32 %v300_v13  ;;  %v312_v16 = vmul.f32 %v974_v14, %v1131_v33 }
 0x275   :  { %v310_v18 = vmul.f32 %v976_v15, %v1135_v35 }
 0x276   :  { %v1169_v25 = vpack.c.bf16 %v312_v16, %v311_v22  ;;  %v947_v16 = vld [vmem:[%s1335_s4] sm:$0xff]   ;;  %v950_v22 = vld [vmem:[%s1335_s4 + $0x18] sm:$0xff]  }
 0x277   :  { %v1167_v23 = vpack.c.bf16 %v310_v18, %v309_v17  ;;  %v948_v17 = vld [vmem:[%s1335_s4 + $0x8] sm:$0xff]   ;;  %913 = vmatprep.subr.bf16.mxu0 %v947_v16  ;;  %v949_v18 = vld [vmem:[%s1335_s4 + $0x10] sm:$0xff]  }
 0x278   :  { %v978_v24 = vpop.eup %977 }
 0x279   :  { %889 = vmatprep.mubr.msk.bf16.mxu0 %vm73_vm0, %v1167_v23  ;;  %v313_v27 = vmul.f32 %v978_v24, %v964_v43 }
 0x27a   :  { %v980_v26 = vpop.eup %979  ;;  %890 = vmatmul.mubr.msk.bf16.vlgmr.msra.gmra.mrb[0].mxu0 %vm73_vm0, %v1169_v25 }
 0x27b   :  { %v314_v28 = vmul.f32 %v980_v26, %v968_v46  ;;  %914 = vmatpush3.bf16.msra.mxu0 %v947_v16 }
 0x27c   :  { %v982_v30 = vpop.eup %981  ;;  %915 = vmatprep.subr.bf16.mxu0 %v948_v17 }
 0x27d   :  { %v1175_v31 = vpack.c.bf16 %v314_v28, %v313_v27  ;;  %v315_v29 = vmul.f32 %v982_v30, %v1144_v41 }
 0x27e   :  { %v984_v32 = vpop.eup %983 }
 0x27f   :  { %893 = vmatprep.mubr.msk.bf16.mxu0 %vm73_vm0, %v1175_v31  ;;  %v316_v33 = vmul.f32 %v984_v32, %v1147_v44  ;;  %916 = vmatpush3.bf16.msra.mxu0 %v948_v17  ;;  %v952_v32 = vld [vmem:[%s1335_s4 + $0x28] sm:$0xff]  }
 0x280   :  { %917 = vmatprep.subr.bf16.mxu0 %v949_v18 }
 0x281   :  { %v1181_v34 = vpack.c.bf16 %v316_v33, %v315_v29 }
 0x283   :  { %894 = vmatmul.mubr.msk.bf16.gmra.mrb[4].mxu0 %vm73_vm0, %v1181_v34 }
 0x284   :  { %918 = vmatpush3.bf16.msra.mxu0 %v949_v18 }
 0x285   :  { %919 = vmatprep.subr.bf16.mxu0 %v950_v22 }
 0x288   :  { %920 = vmatpush3.bf16.msra.mxu0 %v950_v22 }
 0x34d   :  { %v891_v35 = vpop.f32.mrb[0].mxu0 }
 0x34e   :  { %v383_v36 = vpop.f32.mrb[1].mxu0 }
 0x34f   :  { %v892_v37 = vpop.f32.mrb[2].mxu0 }
 0x350   :  { %v415_v38 = vpack.c.bf16 %v892_v37, %v891_v35  ;;  %v386_v39 = vpop.f32.mrb[3].mxu0 }
 0x351   :  { %v414_v40 = vpack.c.bf16 %v386_v39, %v383_v36 }
 0x353   :  { %897 = vmatprep.subr.bf16.mxu1 %v414_v40 }
 0x354   :  { %898 = vmatpush3.bf16.msra.mxu1 %v414_v40 }
 0x355   :  { %899 = vmatprep.subr.bf16.mxu1 %v415_v38 }
 0x356   :  { %v895_v42 = vpop.f32.mrb[4].mxu0 }
 0x357   :  { %v399_v43 = vpop.f32.mrb[5].mxu0 }
 0x358   :  { %v896_v45 = vpop.f32.mrb[6].mxu0  ;;  %900 = vmatpush3.bf16.msra.mxu1 %v415_v38 }
 0x359   :  { %v417_v41 = vpack.c.bf16 %v896_v45, %v895_v42  ;;  %v402_v44 = vpop.f32.mrb[7].mxu0 }
 0x35a   :  { %v416_v46 = vpack.c.bf16 %v402_v44, %v399_v43 }
 0x35c   :  { %901 = vmatprep.subr.bf16.mxu1 %v416_v46 }
 0x35d   :  { %902 = vmatpush3.bf16.msra.mxu1 %v416_v46 }
 0x35e   :  { %903 = vmatprep.subr.bf16.mxu1 %v417_v41 }
 0x361   :  { %904 = vmatpush3.bf16.msra.mxu1 %v417_v41 }
 0x364   :  { %906 = vmatmul.mubr.msk.bf16.vlgmr.msra.gmra.mrb[16].mxu1 %vm175_vm1, %v1106_v19 }
 0x365   :  { %909 = vmatprep.mubr.msk.bf16.mxu1 %vm175_vm1, %v1111_v20 }
 0x36c   :  { %910 = vmatmul.mubr.msk.bf16.gmra.mrb[20].mxu1 %vm175_vm1, %v1120_v21 }
 0x437   :  { %v907_v47 = vpop.f32.mrb[16].mxu1 }
 0x438   :  { %985 = vtanh.f32 %v907_v47  ;;  %v452_v48 = vpop.f32.mrb[17].mxu1 }
 0x439   :  { %987 = vtanh.f32 %v452_v48  ;;  %v908_v49 = vpop.f32.mrb[18].mxu1 }
 0x43a   :  { %989 = vtanh.f32 %v908_v49  ;;  %v455_v50 = vpop.f32.mrb[19].mxu1 }
 0x43b   :  { %991 = vtanh.f32 %v455_v50 }
 0x43f   :  { %v911_v51 = vpop.f32.mrb[20].mxu1 }
 0x440   :  { %993 = vtanh.f32 %v911_v51  ;;  %v468_v52 = vpop.f32.mrb[21].mxu1 }
 0x441   :  { %995 = vtanh.f32 %v468_v52  ;;  %v912_v53 = vpop.f32.mrb[22].mxu1 }
 0x442   :  { %v1191_v19 = vpop.eup %985  ;;  %997 = vtanh.f32 %v912_v53  ;;  %v471_v20 = vpop.f32.mrb[23].mxu1 }
 0x443   :  { %v1193_v54 = vpop.eup %987  ;;  %999 = vtanh.f32 %v471_v20  ;;  %v493_v59 = vmul.f32 %v1191_v19, %v1191_v19 }
 0x444   :  { %v1195_v21 = vpop.eup %989  ;;  %v491_v55 = vmul.f32 %v1193_v54, %v1193_v54 }
 0x445   :  { %v1199_v56 = vpop.eup %991  ;;  %v494_v61 = vmul.f32 %v1195_v21, %v1195_v21  ;;  %v505_v63 = vsel %vm73_vm0, %v493_v59, 0.0 }
 0x446   :  { %v499_v57 = vsel %vm73_vm0, %v491_v55, 0.0  ;;  %v492_v58 = vmul.f32 %v1199_v56, %v1199_v56 }
 0x447   :  { %500 = vadd.xlane.f32.xlu0 %v499_v57  ;;  %v508_v6 = vsel %vm73_vm0, %v494_v61, 0.0 }
 0x448   :  { %v502_v60 = vsel %vm73_vm0, %v492_v58, 0.0 }
 0x449   :  { %503 = vadd.xlane.f32.xlu1 %v502_v60 }
 0x44a   :  { %v1209_v62 = vpop.eup %993 }
 0x44b   :  { %v1212_v0 = vpop.eup %995  ;;  %506 = vadd.xlane.f32.xlu0 %v505_v63  ;;  %v497_v11 = vmul.f32 %v1209_v62, %v1209_v62 }
 0x44c   :  { %v1214_v1 = vpop.eup %997  ;;  %v495_v7 = vmul.f32 %v1212_v0, %v1212_v0 }
 0x44d   :  { %v1219_v8 = vpop.eup %999  ;;  %509 = vadd.xlane.f32.xlu1 %v508_v6  ;;  %v498_v13 = vmul.f32 %v1214_v1, %v1214_v1  ;;  %v517_v14 = vsel %vm73_vm0, %v497_v11, 0.0 }
 0x44e   :  { %v511_v9 = vsel %vm73_vm0, %v495_v7, 0.0  ;;  %v496_v10 = vmul.f32 %v1219_v8, %v1219_v8 }
 0x44f   :  { %512 = vadd.xlane.f32.xlu0 %v511_v9  ;;  %v520_v15 = vsel %vm73_vm0, %v498_v13, 0.0 }
 0x450   :  { %v514_v12 = vsel %vm73_vm0, %v496_v10, 0.0 }
 0x451   :  { %515 = vadd.xlane.f32.xlu1 %v514_v12 }
 0x453   :  { %518 = vadd.xlane.f32.xlu0 %v517_v14 }
 0x455   :  { %521 = vadd.xlane.f32.xlu1 %v520_v15 }
 0x466   :  { %557 = vrot.lane.b32.xlu1 %v1169_v25, %s1033_s3 }
 0x469   :  { %555 = vrot.lane.b32.xlu0 %v1167_v23, %s1033_s3  ;;  %v951_v23 = vld [vmem:[%s1335_s4 + $0x20] sm:$0xff]   ;;  %s1034_s4 = smov 64  }
 0x46a   :  { %921 = vmatprep.subr.bf16.mxu0 %v951_v23 }
 0x46b   :  { %922 = vmatpush3.bf16.msra.mxu0 %v951_v23 }
 0x46c   :  { %923 = vmatprep.subr.bf16.mxu0 %v952_v32 }
 0x46d   :  { %559 = vrot.lane.b32.xlu0 %v1175_v31, %s1033_s3 }
 0x46f   :  { %924 = vmatpush3.bf16.msra.mxu0 %v952_v32 }
 0x4d4   :  { %v501_v24 = vpop.xlane.xlu0 %500 }
 0x4d5   :  { %v523_v25 = vmax.f32 %v501_v24, 1e-24 }
 0x4d6   :  { %v504_v26 = vpop.xlane.xlu1 %503 }
 0x4d7   :  { %1001 = vrsqrt.f32 %v523_v25  ;;  %v524_v27 = vmax.f32 %v504_v26, 1e-24 }
 0x4d8   :  { %v507_v28 = vpop.xlane.xlu0 %506 }
 0x4d9   :  { %1003 = vrsqrt.f32 %v524_v27  ;;  %v525_v30 = vmax.f32 %v507_v28, 1e-24 }
 0x4da   :  { %v510_v31 = vpop.xlane.xlu1 %509 }
 0x4db   :  { %1005 = vrsqrt.f32 %v525_v30  ;;  %v526_v29 = vmax.f32 %v510_v31, 1e-24 }
 0x4dc   :  { %v513_v33 = vpop.xlane.xlu0 %512 }
 0x4dd   :  { %1007 = vrsqrt.f32 %v526_v29  ;;  %v527_v35 = vmax.f32 %v513_v33, 1e-24 }
 0x4de   :  { %v516_v36 = vpop.xlane.xlu1 %515 }
 0x4df   :  { %1009 = vrsqrt.f32 %v527_v35  ;;  %v528_v37 = vmax.f32 %v516_v36, 1e-24 }
 0x4e0   :  { %v519_v38 = vpop.xlane.xlu0 %518 }
 0x4e1   :  { %v1002_v39 = vpop.eup %1001  ;;  %1011 = vrsqrt.f32 %v528_v37  ;;  %v529_v40 = vmax.f32 %v519_v38, 1e-24 }
 0x4e2   :  { %v522_v42 = vpop.xlane.xlu1 %521  ;;  %v539_v41 = vmul.f32 %v1002_v39, %v1193_v54 }
 0x4e3   :  { %v1004_v43 = vpop.eup %1003  ;;  %1013 = vrsqrt.f32 %v529_v40  ;;  %v530_v45 = vmax.f32 %v522_v42, 1e-24 }
 0x4e4   :  { %v540_v44 = vmul.f32 %v1004_v43, %v1199_v56  ;;  %v556_v60 = vpop.permute.xlu0 %555 }
 0x4e5   :  { %v1006_v46 = vpop.eup %1005  ;;  %1015 = vrsqrt.f32 %v530_v45  ;;  %v576_v61 = vsel %vm73_vm0, %v1074_v2, %v556_v60 }
 0x4e6   :  { %v547_v47 = vpack.c.bf16 %v540_v44, %v539_v41  ;;  %v541_v49 = vmul.f32 %v1006_v46, %v1191_v19  ;;  %v558_v59 = vpop.permute.xlu1 %557 }
 0x4e7   :  { %v1008_v48 = vpop.eup %1007 }
 0x4e8   :  { %567 = vrot.lane.b32.xlu1 %v547_v47, %s1034_s4  ;;  %v542_v50 = vmul.f32 %v1008_v48, %v1195_v21  ;;  %v560_v6 = vpop.permute.xlu0 %559 }
 0x4e9   :  { %v1010_v51 = vpop.eup %1009  ;;  %v580_v7 = vsel %vm73_vm0, %v1086_v4, %v560_v6 }
 0x4ea   :  { %v548_v52 = vpack.c.bf16 %v542_v50, %v541_v49  ;;  %v543_v20 = vmul.f32 %v1010_v51, %v1212_v0 }
 0x4eb   :  { %v1012_v53 = vpop.eup %1011 }
 0x4ec   :  { %569 = vrot.lane.b32.xlu1 %v548_v52, %s1034_s4  ;;  %v544_v54 = vmul.f32 %v1012_v53, %v1219_v8 }
 0x4ed   :  { %v1014_v55 = vpop.eup %1013 }
 0x4ee   :  { %v549_v56 = vpack.c.bf16 %v544_v54, %v543_v20  ;;  %v545_v58 = vmul.f32 %v1014_v55, %v1209_v62 }
 0x4ef   :  { %v1016_v57 = vpop.eup %1015 }
 0x4f0   :  { %561 = vrot.lane.b32.xlu1 %v1181_v34, %s1033_s3  ;;  %571 = vrot.lane.b32.xlu0 %v549_v56, %s1034_s4  ;;  %v546_v19 = vmul.f32 %v1016_v57, %v1214_v1  ;;  %v578_v34 = vsel %vm73_vm0, %v1081_v3, %v558_v59 }
 0x4f2   :  { %v550_v21 = vpack.c.bf16 %v546_v19, %v545_v58 }
 0x4f4   :  { %573 = vrot.lane.b32.xlu1 %v550_v21, %s1034_s4 }
 0x55a   :  { %v568_v63 = vpop.permute.xlu1 %567 }
 0x55b   :  { %v584_v0 = vsel %vm175_vm1, %v576_v61, %v568_v63 }
 0x55c   :  { %925 = vmatprep.mubr.msk.bf16.mxu0 %vm639_vm2, %v584_v0 }
 0x55e   :  { %v570_v62 = vpop.permute.xlu1 %569 }
 0x55f   :  { %v586_v1 = vsel %vm175_vm1, %v578_v34, %v570_v62 }
 0x560   :  { %926 = vmatmul.mubr.msk.bf16.vlgmr.msra.gmra.mrb[8].mxu0 %vm639_vm2, %v586_v1 }
 0x562   :  { %v572_v8 = vpop.permute.xlu0 %571  ;;  %v562_v9 = vpop.permute.xlu1 %561 }
 0x563   :  { %v588_v2 = vsel %vm175_vm1, %v580_v7, %v572_v8  ;;  %v582_v10 = vsel %vm73_vm0, %v1095_v5, %v562_v9 }
 0x564   :  { %929 = vmatprep.mubr.msk.bf16.mxu0 %vm639_vm2, %v588_v2 }
 0x566   :  { %v574_v11 = vpop.permute.xlu1 %573 }
 0x567   :  { %v590_v3 = vsel %vm175_vm1, %v582_v10, %v574_v11 }
 0x568   :  { %930 = vmatmul.mubr.msk.bf16.gmra.mrb[12].mxu0 %vm639_vm2, %v590_v3 }
 0x633   :  { %v927_v12 = vpop.f32.mrb[8].mxu0 }
 0x634   :  { %v715_v13 = vmul.f32 %v927_v12, %v927_v12  ;;  %v682_v14 = vpop.f32.mrb[9].mxu0 }
 0x635   :  { %v1281_v15 = vpop.f32.mrb[10].mxu0  ;;  %v713_v4 = vmul.f32 %v682_v14, %v682_v14 }
 0x636   :  { %v685_v16 = vpop.f32.mrb[11].mxu0  ;;  %v727_v17 = vsel %vm73_vm0, %v715_v13, 0.0  ;;  %v716_v5 = vmul.f32 %v1281_v15, %v1281_v15 }
 0x637   :  { %v714_v18 = vmul.f32 %v685_v16, %v685_v16  ;;  %728 = vadd.xlane.f32.xlu0 %v727_v17  ;;  %v721_v23 = vsel %vm73_vm0, %v713_v4, 0.0 }
 0x638   :  { %v730_v30 = vsel %vm73_vm0, %v716_v5, 0.0 }
 0x639   :  { %v724_v22 = vsel %vm73_vm0, %v714_v18, 0.0 }
 0x63a   :  { %725 = vadd.xlane.f32.xlu1 %v724_v22 }
 0x63b   :  { %722 = vadd.xlane.f32.xlu0 %v721_v23  ;;  %v1288_v24 = vpop.f32.mrb[12].mxu0 }
 0x63c   :  { %v698_v25 = vpop.f32.mrb[13].mxu0  ;;  %v719_v33 = vmul.f32 %v1288_v24, %v1288_v24 }
 0x63d   :  { %v932_v26 = vpop.f32.mrb[14].mxu0  ;;  %v717_v27 = vmul.f32 %v698_v25, %v698_v25 }
 0x63e   :  { %v701_v28 = vpop.f32.mrb[15].mxu0  ;;  %v720_v32 = vmul.f32 %v932_v26, %v932_v26  ;;  %v739_v37 = vsel %vm73_vm0, %v719_v33, 0.0 }
 0x63f   :  { %v718_v31 = vmul.f32 %v701_v28, %v701_v28  ;;  %731 = vadd.xlane.f32.xlu0 %v730_v30  ;;  %v733_v35 = vsel %vm73_vm0, %v717_v27, 0.0 }
 0x640   :  { %v742_v36 = vsel %vm73_vm0, %v720_v32, 0.0 }
 0x641   :  { %v736_v29 = vsel %vm73_vm0, %v718_v31, 0.0 }
 0x642   :  { %737 = vadd.xlane.f32.xlu1 %v736_v29 }
 0x643   :  { %734 = vadd.xlane.f32.xlu0 %v733_v35 }
 0x646   :  { %743 = vadd.xlane.f32.xlu1 %v742_v36 }
 0x647   :  { %740 = vadd.xlane.f32.xlu0 %v739_v37 }
 0x6c4   :  { %v729_v38 = vpop.xlane.xlu0 %728 }
 0x6c5   :  { %v747_v39 = vmax.f32 %v729_v38, 1e-24 }
 0x6c7   :  { %1017 = vrsqrt.f32 %v747_v39  ;;  %v726_v40 = vpop.xlane.xlu1 %725 }
 0x6c8   :  { %v746_v42 = vmax.f32 %v726_v40, 1e-24  ;;  %v723_v43 = vpop.xlane.xlu0 %722 }
 0x6c9   :  { %v745_v45 = vmax.f32 %v723_v43, 1e-24 }
 0x6ca   :  { %1019 = vrsqrt.f32 %v746_v42 }
 0x6cb   :  { %1021 = vrsqrt.f32 %v745_v45 }
 0x6cc   :  { %v732_v41 = vpop.xlane.xlu0 %731 }
 0x6cd   :  { %v748_v44 = vmax.f32 %v732_v41, 1e-24 }
 0x6cf   :  { %1023 = vrsqrt.f32 %v748_v44  ;;  %v738_v46 = vpop.xlane.xlu1 %737 }
 0x6d0   :  { %v750_v47 = vmax.f32 %v738_v46, 1e-24  ;;  %v735_v48 = vpop.xlane.xlu0 %734 }
 0x6d1   :  { %v1018_v49 = vpop.eup %1017  ;;  %v749_v50 = vmax.f32 %v735_v48, 1e-24 }
 0x6d2   :  { %v763_v51 = vmul.f32 %v1018_v49, %v927_v12  ;;  %1025 = vrsqrt.f32 %v750_v47 }
 0x6d3   :  { %1027 = vrsqrt.f32 %v749_v50  ;;  %v744_v52 = vpop.xlane.xlu1 %743 }
 0x6d4   :  { %v1020_v53 = vpop.eup %1019  ;;  %771 = vst.msk [vmem:[%s1336_s5 + $0x10] sm:$0xff] %vm73_vm0, %v763_v51  ;;  %v752_v20 = vmax.f32 %v744_v52, 1e-24  ;;  %v741_v54 = vpop.xlane.xlu0 %740 }
 0x6d5   :  { %v1022_v55 = vpop.eup %1021  ;;  %v762_v56 = vmul.f32 %v1020_v53, %v685_v16  ;;  %v751_v57 = vmax.f32 %v741_v54, 1e-24 }
 0x6d6   :  { %v761_v58 = vmul.f32 %v1022_v55, %v682_v14  ;;  %1029 = vrsqrt.f32 %v752_v20 }
 0x6d7   :  { %770 = vst.msk [vmem:[%s1336_s5 + $0x8] sm:$0xff] %vm73_vm0, %v762_v56  ;;  %1031 = vrsqrt.f32 %v751_v57 }
 0x6d8   :  { %769 = vst.msk [vmem:[%s1336_s5] sm:$0xff] %vm73_vm0, %v761_v58 }
 0x6d9   :  { %v1024_v19 = vpop.eup %1023 }
 0x6da   :  { %v764_v21 = vmul.f32 %v1024_v19, %v1281_v15 }
 0x6dc   :  { %v1026_v59 = vpop.eup %1025  ;;  %772 = vst.msk [vmem:[%s1336_s5 + $0x18] sm:$0xff] %vm73_vm0, %v764_v21 }
 0x6dd   :  { %v1028_v60 = vpop.eup %1027  ;;  %v766_v61 = vmul.f32 %v1026_v59, %v701_v28 }
 0x6de   :  { %v765_v63 = vmul.f32 %v1028_v60, %v698_v25 }
 0x6df   :  { %774 = vst.msk [vmem:[%s1336_s5 + $0x28] sm:$0xff] %vm73_vm0, %v766_v61 }
 0x6e0   :  { %v1030_v0 = vpop.eup %1029  ;;  %773 = vst.msk [vmem:[%s1336_s5 + $0x20] sm:$0xff] %vm73_vm0, %v765_v63 }
 0x6e1   :  { %v1032_v34 = vpop.eup %1031  ;;  %v768_v6 = vmul.f32 %v1030_v0, %v932_v26 }
 0x6e2   :  { %v767_v62 = vmul.f32 %v1032_v34, %v1288_v24 }
 0x6e3   :  { %776 = vst.msk [vmem:[%s1336_s5 + $0x38] sm:$0xff] %vm73_vm0, %v768_v6 }
 0x6e4   :  { %775 = vst.msk [vmem:[%s1336_s5 + $0x30] sm:$0xff] %vm73_vm0, %v767_v62 }

</bundles_post_ra>
